<compile_context>
chip_gen: v5e
topology: v5e:2x2
jax: 0.10.0
libtpu: 0.0.40
codegen_flags: <defaults>
</compile_context>

<pallas_src>
from typing import NamedTuple

import jax
import jax.numpy as jnp
from jax.experimental import pallas as pl
from jax.experimental.pallas import tpu as pltpu


def _round_up(x, m):
    return ((x + m - 1) // m) * m


class PreparedHeadWeights(NamedTuple):
    """Weights pre-transposed / pre-padded once at init (outside the hot path)."""
    w1t: jax.Array   # [D_in, D_inner]   dense.weight.T
    w2t: jax.Array   # [D_inner, N_p]    out_proj.weight.T, cols padded to tn mult.
    out_dim: int     # original (unpadded) D_out
    tn: int          # vocab tile width used for the padding


def prepare_bart_generation_head_weights(dense_weight, out_proj_weight, *,
                                         tn=None, pad_tiles_to_multiple_of=1):
    """dense_weight:    [D_inner, D_in]   (PyTorch nn.Linear (out, in) layout)
       out_proj_weight: [D_out, D_inner]  (PyTorch nn.Linear (out, in) layout)

    Call once at model init.  `pad_tiles_to_multiple_of=2` guarantees an even
    number of vocab tiles so the v7x decode split always engages (costs a bit
    of extra weight padding)."""
    D_inner, D_in = dense_weight.shape
    D_out, D_inner2 = out_proj_weight.shape
    assert D_inner2 == D_inner

    w_item = jnp.dtype(out_proj_weight.dtype).itemsize
    if tn is None:
        # Lane-dense (128-multiple) vocab tiles, as large as the VMEM budget
        # allows for the dtype; clamp for small heads.
        tn = 2048 if w_item <= 2 else 1024
        tn = min(tn, _round_up(D_out, 128))
    N_p = _round_up(D_out, tn * pad_tiles_to_multiple_of)

    w1t = jnp.asarray(dense_weight).T          # [D_in, D_inner]
    w2t = jnp.asarray(out_proj_weight).T       # [D_inner, D_out]
    if N_p != D_out:
        w2t = jnp.pad(w2t, ((0, 0), (0, N_p - D_out)))
    return PreparedHeadWeights(w1t=w1t, w2t=w2t, out_dim=D_out, tn=tn)


def _head_kernel(x_ref, w1_ref, w2_ref, o_ref, h_ref):
    # x_ref:  [TM, D_in]        current M tile of hidden states
    # w1_ref: [D_in, D_inner]   dense weight, pre-transposed (fetched once)
    # w2_ref: [D_inner, TN]     out_proj weight tile (canonical [K, N])
    # o_ref:  [TM, TN]
    # h_ref:  [TM, D_inner]     VMEM scratch caching the first matmul
    #
    # The first matmul runs once per value of the *outer* grid axis, gated on
    # the inner ("arbitrary", never core-sharded) vocab axis being at step 0;
    # all vocab tiles for this M tile reuse the cached h.
    @pl.when(pl.program_id(1) == 0)
    def _():
        h = jnp.dot(x_ref[...], w1_ref[...], preferred_element_type=jnp.float32)
        # Keep h in the input dtype (matches a same-dtype PyTorch module and
        # halves VMEM / MXU cost for bf16 activations).
        h_ref[...] = h.astype(h_ref.dtype)

    o_ref[...] = jnp.dot(h_ref[...], w2_ref[...],
                         preferred_element_type=jnp.float32).astype(o_ref.dtype)


def bart_generation_head(hidden_states, weights: PreparedHeadWeights, *, tm=None):
    """hidden_states: [B, S, D_in].  `weights` from prepare_bart_generation_head_weights."""
    B, S, D_in = hidden_states.shape
    w1t, w2t, out_dim, tn = weights
    D_in_w, D_inner = w1t.shape
    assert D_in_w == D_in
    _, N_p = w2t.shape
    M = B * S
    dtype = hidden_states.dtype
    x_item = jnp.dtype(dtype).itemsize
    w_item = jnp.dtype(w2t.dtype).itemsize

    # M tile: sublane-aligned; big enough that the vocab matmul's intensity
    # (2*tm/itemsize FLOP per streamed w2 byte) clears the roofline knee on
    # v6e/v7x for bf16, capped for f32 to stay inside v7x's 64 MiB VMEM.
    if tm is None:
        tm_max = 1024 if x_item <= 2 else 512
        tm = min(tm_max, _round_up(M, 8))
    M_p = _round_up(M, tm)

    x2d = hidden_states.reshape(M, D_in)
    if M_p != M:
        x2d = jnp.pad(x2d, ((0, M_p - M), (0, 0)))

    num_m = M_p // tm
    num_n = N_p // tn
    # Decode-sized calls (one M tile): split D_out across a leading parallel
    # axis of size 2 so both v7x TensorCores get half the vocab tiles.
    split = 2 if (num_m == 1 and num_n >= 2 and num_n % 2 == 0) else 1
    g0 = num_m * split
    g1 = num_n // split
    grid = (g0, g1)

    if split == 1:
        x_map = lambda i, j: (i, 0)
        w2_map = lambda i, j: (0, j)
        o_map = lambda i, j: (i, j)
    else:
        x_map = lambda i, j: (0, 0)                       # single M tile
        w2_map = lambda i, j: (0, i * g1 + j)             # half i, tile j within half
        o_map = lambda i, j: (0, i * g1 + j)
    w1_map = lambda i, j: (0, 0)

    # Double-buffered working set -> explicit scoped-VMEM limit with headroom
    # (v5e default 16 MiB is too small for the f32 defaults; v7x physical is
    # only 64 MiB so cap there).
    vmem_est = (2 * tm * D_in * x_item            # x tile (double-buffered)
                + 2 * D_inner * D_in * w_item     # dense weight (fetched once)
                + 2 * D_inner * tn * w_item       # w2 tile
                + 2 * tm * tn * x_item            # output tile
                + tm * D_inner * x_item)          # h scratch
    vmem_limit = int(min(64 << 20, max(32 << 20, int(1.25 * vmem_est) + (2 << 20))))

    cost = pl.CostEstimate(
        flops=2 * g0 * tm * D_in * D_inner + 2 * M_p * D_inner * N_p,
        transcendentals=0,
        bytes_accessed=(M_p * D_in * x_item
                        + D_inner * D_in * w_item
                        + num_m * N_p * D_inner * w_item   # w2 re-streamed per M tile
                        + M_p * N_p * x_item),
    )

    out2d = pl.pallas_call(
        _head_kernel,
        out_shape=jax.ShapeDtypeStruct((M_p, N_p), dtype),
        grid_spec=pltpu.PrefetchScalarGridSpec(
            num_scalar_prefetch=0,
            grid=grid,
            in_specs=[
                pl.BlockSpec((tm, D_in), x_map),          # activation tile
                pl.BlockSpec((D_in, D_inner), w1_map),    # dense weight (whole, DMA'd once)
                pl.BlockSpec((D_inner, tn), w2_map),      # out_proj weight tile [K, N]
            ],
            out_specs=pl.BlockSpec((tm, tn), o_map),
            scratch_shapes=[pltpu.VMEM((tm, D_inner), dtype)],   # cached h
        ),
        compiler_params=pltpu.CompilerParams(
            dimension_semantics=("parallel", "arbitrary"),
            vmem_limit_bytes=vmem_limit),
        cost_estimate=cost,
    )(x2d, w1t, w2t)

    return out2d[:M, :out_dim].reshape(B, S, out_dim)


if __name__ == "__main__":
    key = jax.random.PRNGKey(0)
    kx, kw1, kw2, kw3 = jax.random.split(key, 4)

    B, S = 2, 8
    input_dim, inner_dim, out_dim = 32, 64, 128

    hidden_states = jax.random.normal(kx, (B, S, input_dim), dtype=jnp.float32)
    dense_weight = (jax.random.normal(kw1, (inner_dim, input_dim), dtype=jnp.float32)
                    * (1.0 / jnp.sqrt(input_dim)))
    out_proj_weight = (jax.random.normal(kw2, (out_dim, inner_dim), dtype=jnp.float32)
                       * (1.0 / jnp.sqrt(inner_dim)))

    # --- Test 1: default tiles, single-tile grid ----------------------------
    w = prepare_bart_generation_head_weights(dense_weight, out_proj_weight)
    out = jax.block_until_ready(bart_generation_head(hidden_states, w))
    ref = (hidden_states @ dense_weight.T) @ out_proj_weight.T
    assert out.shape == (B, S, out_dim)
    assert jnp.allclose(out, ref, atol=1e-4, rtol=1e-4)

    # --- Test 2: force a 2x2 grid (multiple M tiles -> h-cache reuse path) --
    out_dim2 = 256
    out_proj_weight2 = (jax.random.normal(kw3, (out_dim2, inner_dim), dtype=jnp.float32)
                        * (1.0 / jnp.sqrt(inner_dim)))
    w2 = prepare_bart_generation_head_weights(dense_weight, out_proj_weight2, tn=128)
    out2 = jax.block_until_ready(bart_generation_head(hidden_states, w2, tm=8))
    ref2 = (hidden_states @ dense_weight.T) @ out_proj_weight2.T
    assert out2.shape == (B, S, out_dim2)
    assert jnp.allclose(out2, ref2, atol=1e-4, rtol=1e-4)

    # --- Test 3: decode-split path (1 M tile, even #vocab tiles -> split=2) -
    out_dim3 = 512
    out_proj_weight3 = (jax.random.normal(kw3, (out_dim3, inner_dim), dtype=jnp.float32)
                        * (1.0 / jnp.sqrt(inner_dim)))
    w3 = prepare_bart_generation_head_weights(dense_weight, out_proj_weight3, tn=128)
    out3 = jax.block_until_ready(bart_generation_head(hidden_states, w3))
    ref3 = (hidden_states @ dense_weight.T) @ out_proj_weight3.T
    assert out3.shape == (B, S, out_dim3)
    assert jnp.allclose(out3, ref3, atol=1e-4, rtol=1e-4)

    print("KERNEL_OK")
</pallas_src>

<mosaic_0001>
module attributes {stable_mosaic.version = 11 : i64} {
  func.func @_head_kernel(%arg0: i32, %arg1: i32, %arg2: memref<16x32xf32, #tpu.memory_space<vmem>>, %arg3: memref<32x64xf32, #tpu.memory_space<vmem>>, %arg4: memref<64x128xf32, #tpu.memory_space<vmem>>, %arg5: memref<16x128xf32, #tpu.memory_space<vmem>>, %arg6: memref<16x64xf32, #tpu.memory_space<vmem>>) attributes {dimension_semantics = [#tpu.dimension_semantics<parallel>, #tpu.dimension_semantics<arbitrary>], iteration_bounds = array<i64: 1, 1>, scalar_prefetch = 0 : i64, scratch_operands = 1 : i64, tpu.core_type = #tpu.core_type<tc>, window_params = [{transform_indices = @transform_0, window_bounds = array<i64: 16, 32>}, {pipeline_mode = #tpu.pipeline_mode<synchronous>, transform_indices = @transform_1, window_bounds = array<i64: 32, 64>}, {transform_indices = @transform_2, window_bounds = array<i64: 64, 128>}, {transform_indices = @transform_3, window_bounds = array<i64: 16, 128>}]} {
    %c0_i32 = arith.constant 0 : i32
    %0 = arith.cmpi eq, %arg1, %c0_i32 : i32
    %1 = arith.extui %0 : i1 to i32
    %c0_i32_0 = arith.constant 0 : i32
    %2 = arith.cmpi ne, %1, %c0_i32_0 : i32
    scf.if %2 {
      %c0_6 = arith.constant 0 : index
      %c0_7 = arith.constant 0 : index
      %7 = vector.load %arg2[%c0_6, %c0_7] : memref<16x32xf32, #tpu.memory_space<vmem>>, vector<16x32xf32>
      %c0_8 = arith.constant 0 : index
      %c0_9 = arith.constant 0 : index
      %8 = vector.load %arg3[%c0_8, %c0_9] : memref<32x64xf32, #tpu.memory_space<vmem>>, vector<32x64xf32>
      %cst_10 = arith.constant dense<0.000000e+00> : vector<16x64xf32>
      %9 = tpu.matmul %7, %8, %cst_10 {dimension_numbers = #tpu.dot_dimension_numbers<[1], [0], [0], [1], [0, 0, 1, 1], [], []>} : vector<16x32xf32>, vector<32x64xf32>, vector<16x64xf32> -> vector<16x64xf32>
      %c0_11 = arith.constant 0 : index
      %c0_12 = arith.constant 0 : index
      %10 = vector.load %arg6[%c0_11, %c0_12] : memref<16x64xf32, #tpu.memory_space<vmem>>, vector<16x64xf32>
      tpu.vector_store %arg6[%c0_11, %c0_12], %9 {strides = array<i32>} : memref<16x64xf32, #tpu.memory_space<vmem>>, vector<16x64xf32>,
    } else {
    }
    %c0 = arith.constant 0 : index
    %c0_1 = arith.constant 0 : index
    %3 = vector.load %arg6[%c0, %c0_1] : memref<16x64xf32, #tpu.memory_space<vmem>>, vector<16x64xf32>
    %c0_2 = arith.constant 0 : index
    %c0_3 = arith.constant 0 : index
    %4 = vector.load %arg4[%c0_2, %c0_3] : memref<64x128xf32, #tpu.memory_space<vmem>>, vector<64x128xf32>
    %cst = arith.constant dense<0.000000e+00> : vector<16x128xf32>
    %5 = tpu.matmul %3, %4, %cst {dimension_numbers = #tpu.dot_dimension_numbers<[1], [0], [0], [1], [0, 0, 1, 1], [], []>} : vector<16x64xf32>, vector<64x128xf32>, vector<16x128xf32> -> vector<16x128xf32>
    %c0_4 = arith.constant 0 : index
    %c0_5 = arith.constant 0 : index
    %6 = vector.load %arg5[%c0_4, %c0_5] : memref<16x128xf32, #tpu.memory_space<vmem>>, vector<16x128xf32>
    tpu.vector_store %arg5[%c0_4, %c0_5], %5 {strides = array<i32>} : memref<16x128xf32, #tpu.memory_space<vmem>>, vector<16x128xf32>,
    return
  }
  func.func @transform_0(%arg0: i32, %arg1: i32) -> (i32, i32) {
    %c0_i32 = arith.constant 0 : i32
    %c0_i32_0 = arith.constant 0 : i32
    return %arg0, %c0_i32 : i32, i32
  }
  func.func @transform_1(%arg0: i32, %arg1: i32) -> (i32, i32) {
    %c0_i32 = arith.constant 0 : i32
    %c0_i32_0 = arith.constant 0 : i32
    %c0_i32_1 = arith.constant 0 : i32
    return %c0_i32, %c0_i32_0 : i32, i32
  }
  func.func @transform_2(%arg0: i32, %arg1: i32) -> (i32, i32) {
    %c0_i32 = arith.constant 0 : i32
    %c0_i32_0 = arith.constant 0 : i32
    return %c0_i32, %arg1 : i32, i32
  }
  func.func @transform_3(%arg0: i32, %arg1: i32) -> (i32, i32) {
    %c0_i32 = arith.constant 0 : i32
    return %arg0, %arg1 : i32, i32
  }
}

</mosaic_0001>

<bundles_post_ra>
// kernel: tpu_custom_call.1
= control target key start
LH: loop header
LB: loop body
LE: loop exit
PB: predicated region body
PF: predicated region fallthrough
CT: control target
= control target key end

     0   :  { %8 = vsyncpa [#allocation4], 0  ;;  %s341_s0 = inlined_call_operand.hbm [shape: f32[16,32], index: 0, kind: input, shape index: {}]   ;;  %s342_s1 = inlined_call_operand.hbm [shape: f32[32,64], index: 1, kind: input, shape index: {}]   ;;  %s343_s2 = inlined_call_operand.hbm [shape: f32[64,128], index: 2, kind: input, shape index: {}]   ;;  %s344_s3 = inlined_call_operand.hbm [shape: f32[16,128], index: 3, kind: output, shape index: {}]  }
   0x1   :  { %9 = vsyncpa [#allocation7], 0 }
   0x2   :  { %10 = vsyncpa [#allocation5], 0  ;;  %s28_s14 = sshll.u32 %s342_s1, 4  ;;  %s291_s15 = smov [#allocation6]   ;;  %s29_s14 = int_to_ptr.hbm [resolvable:$true] %s28_s14 }
   0x3   :  { %s30_s16 = sshll.u32 %s291_s15, 4  ;;  %s15_s19 = sshll.u32 %s341_s0, 4  ;;  %s31_s16 = int_to_ptr.vmem [resolvable:$true] %s30_s16  ;;  %s16_s19 = int_to_ptr.hbm [resolvable:$true] %s15_s19 }
   0x4   :  { %s292_s20 = smov 128   ;;  %s293_s21 = smov 8  }
   0x5   :  { %36 = dma.hbm_to_vmem [thread:$0]  %s29_s14, 512, %s31_s16, [#allocation7], %s292_s20, %s292_s20, %s293_s21  }
   0x6   :  { %s294_s22 = smov [#allocation3]   ;;  %s41_s1 = sshll.u32 %s343_s2, 4  ;;  %s42_s1 = int_to_ptr.hbm [resolvable:$true] %s41_s1 }
   0x7   :  { %s17_s23 = sshll.u32 %s294_s22, 4  ;;  %s295_s0 = smov [#allocation8]   ;;  %s18_s23 = int_to_ptr.vmem [resolvable:$true] %s17_s23 }
   0x8   :  { %23 = dma.hbm_to_vmem [thread:$0]  %s16_s19, 256, %s18_s23, [#allocation4], %s292_s20, %s292_s20, %s293_s21  }
   0x9   :  { %s43_s26 = sshll.u32 %s295_s0, 4  ;;  %s44_s26 = int_to_ptr.vmem [resolvable:$true] %s43_s26 }
   0xa   :  { %49 = dma.hbm_to_vmem [thread:$0]  %s42_s1, 1024, %s44_s26, [#allocation7], %s292_s20, %s292_s20, %s293_s21  }
   0xb   :  { %285 = dma.done.wait [#allocation4], 256  }
   0xc   :  { %286 = vsyncadd [#allocation4], 4294967040 }
   0xd   :  { %287 = dma.done.wait [#allocation7], 1536  }
   0xe   :  { %288 = vsyncadd [#allocation7], 4294965760  ;;  %v71_v0 = vld [vmem:[#allocation6 + $0x18] sm:$0xff]  ;;  %v70_v1 = vld [vmem:[#allocation6 + $0x10] sm:$0xff]  ;;  %vm72_vm0 = vcmask 261120   ;;  %vm102_vm1 = vcmask 523264  }
   0xf   :  { %171 = vmatpush.msra.mxu3 %v71_v0  ;;  %91 = vmatpush.msra.mxu0 %v71_v0  ;;  %v69_v2 = vld [vmem:[#allocation6 + $0x8] sm:$0xff]  ;;  %v114_v3 = vld [vmem:[#allocation8 + $0x38] sm:$0xff]  ;;  %v113_v4 = vld [vmem:[#allocation8 + $0x30] sm:$0xff]  ;;  %s296_s2 = smov [#allocation9]   ;;  %s153_s30 = sshll.u32 %s344_s3, 4  ;;  %s154_s30 = int_to_ptr.hbm [resolvable:$true] %s153_s30 }
  0x10   :  { %v68_v5 = vld [vmem:[#allocation6] sm:$0xff]  ;;  %175 = vmatpush.msra.mxu2 %v114_v3  ;;  %130 = vmatpush.msra.mxu1 %v114_v3  ;;  %v67_v6 = vld [vmem:[#allocation3 + $0x8] sm:$0xff]  ;;  %v66_v7 = vld [vmem:[#allocation3] sm:$0xff]  ;;  %s151_s27 = sshll.u32 %s296_s2, 4  ;;  %s152_s27 = int_to_ptr.vmem [resolvable:$true] %s151_s27 }
  0x11   :  { %172 = vmatpush.msra.mxu3 %v70_v1  ;;  %92 = vmatpush.msra.mxu0 %v70_v1  ;;  %v112_v8 = vld [vmem:[#allocation8 + $0x28] sm:$0xff]  ;;  %v111_v9 = vld [vmem:[#allocation8 + $0x20] sm:$0xff]  ;;  %v110_v10 = vld [vmem:[#allocation8 + $0x18] sm:$0xff] }
  0x12   :  { %176 = vmatpush.msra.mxu2 %v113_v4  ;;  %131 = vmatpush.msra.mxu1 %v113_v4  ;;  %v109_v11 = vld [vmem:[#allocation8 + $0x10] sm:$0xff]  ;;  %v108_v12 = vld [vmem:[#allocation8 + $0x8] sm:$0xff]  ;;  %v107_v13 = vld [vmem:[#allocation8] sm:$0xff] }
  0x13   :  { %173 = vmatpush.msra.mxu3 %v69_v2  ;;  %93 = vmatpush.msra.mxu0 %v69_v2 }
  0x14   :  { %177 = vmatpush.msra.mxu2 %v112_v8  ;;  %132 = vmatpush.msra.mxu1 %v112_v8 }
  0x15   :  { %174 = vmatpush.msra.mxu3 %v68_v5  ;;  %94 = vmatpush.msra.mxu0 %v68_v5 }
  0x16   :  { %168 = vmatmul.msk.f32.vlgmr.msra.gmra.mxu3 %vm72_vm0, %v67_v6  ;;  %167 = vmatmul.msk.f32.vlgmr.msra.gmra.mxu0 %vm72_vm0, %v66_v7 }
  0x17   :  { %178 = vmatpush.msra.mxu2 %v111_v9  ;;  %133 = vmatpush.msra.mxu1 %v111_v9 }
  0x19   :  { %179 = vmatpush.msra.mxu2 %v110_v10  ;;  %134 = vmatpush.msra.mxu1 %v110_v10 }
  0x1b   :  { %180 = vmatpush.msra.mxu2 %v109_v11  ;;  %135 = vmatpush.msra.mxu1 %v109_v11 }
  0x1d   :  { %181 = vmatpush.msra.mxu2 %v108_v12  ;;  %136 = vmatpush.msra.mxu1 %v108_v12 }
  0x1f   :  { %182 = vmatpush.msra.mxu2 %v107_v13  ;;  %137 = vmatpush.msra.mxu1 %v107_v13 }
  0x93   :  { %v96_v14 = vpop.f32.mrf.mxu0 }
  0x94   :  { %103 = vst.msk [vmem:[#allocation2] sm:$0xff] %vm102_vm1, %v96_v14 }
  0x99   :  { %v99_v15 = vpop.f32.mrf.mxu3 }
  0x9a   :  { %104 = vst.msk [vmem:[#allocation2 + $0x8] sm:$0xff] %vm102_vm1, %v99_v15 }
  0x9b   :  { %v105_v16 = vld [vmem:[#allocation2] sm:$0xff] }
  0x9c   :  { %169 = vmatmul.msk.f32.vlgmr.msra.gmra.mxu1 %vm102_vm1, %v105_v16 }
  0xa1   :  { %v106_v17 = vld [vmem:[#allocation2 + $0x8] sm:$0xff] }
  0xa2   :  { %170 = vmatmul.msk.f32.vlgmr.msra.gmra.mxu2 %vm102_vm1, %v106_v17 }
 0x119   :  { %v139_v18 = vpop.f32.mrf.mxu1 }
 0x11a   :  { %145 = vst [vmem:[#allocation9] sm:$0xff] %v139_v18 }
 0x125   :  { %v142_v19 = vpop.f32.mrf.mxu2 }
 0x126   :  { %146 = vst [vmem:[#allocation9 + $0x8] sm:$0xff] %v142_v19 }
 0x127   :  { %159 = dma.vmem_to_hbm [thread:$0]  %s152_s27, 256, %s154_s30, [#allocation5], %s292_s20, %s292_s20, %s293_s21  }
 0x128   :  { %289 = dma.done.wait [#allocation5], 256  }
 0x129   :  { %290 = vsyncadd [#allocation5], 4294967040 }
 0x12a   :  { %164 = vsyncpa [#allocation4], 1 }
 0x12b   :  { %165 = vsyncpa [#allocation7], 1 }
 0x12c   :  { %166 = vsyncpa [#allocation5], 1 }

</bundles_post_ra>
